<compile_context>
chip_gen: v6e
topology: v6e:2x2x1
jax: 0.10.0
libtpu: 0.0.40
codegen_flags: <defaults>
</compile_context>

<pallas_src>
import jax
import jax.numpy as jnp
from jax.experimental import pallas as pl
from jax.experimental.pallas import tpu as pltpu


def _gelu(x):
    # BERT-style tanh-approximation GELU (matches from-scratch GELU() modules).
    return 0.5 * x * (1.0 + jnp.tanh(0.7978845608028654 * (x + 0.044715 * x * x * x)))


def _round_up(a, b):
    return (a + b - 1) // b * b


def _device_defaults():
    """Per-generation tile sizes / VMEM budgets (best effort, safe fallback)."""
    kind = ""
    try:
        kind = jax.devices()[0].device_kind.lower()
    except Exception:
        pass
    if "v5 lite" in kind or "v5lite" in kind or "v5e" in kind:
        # Lowest HBM BW: large row tile to cut w_dec re-streaming; 3-deep w_dec
        # buffering to hide the slab DMA. 128 MiB physical VMEM.
        return dict(row_tile=512, vocab_tile=2048,
                    vmem_limit=96 * 1024 * 1024, wdec_buffers=3)
    if "v6" in kind:
        return dict(row_tile=1024, vocab_tile=2048,
                    vmem_limit=96 * 1024 * 1024, wdec_buffers=2)
    if "v7" in kind:
        # Only 64 MiB VMEM per TensorCore -> leave headroom for compiler scratch.
        return dict(row_tile=512, vocab_tile=1024,
                    vmem_limit=48 * 1024 * 1024, wdec_buffers=2)
    # Unknown generation: conservative (also valid on v7x).
    return dict(row_tile=512, vocab_tile=1024,
                vmem_limit=48 * 1024 * 1024, wdec_buffers=2)


def mlm_kernel(x_ref, w1_ref, b1_ref, gamma_ref, beta_ref, wdec_ref, out_ref, h_ref):
    """Fused: Linear -> GELU -> LayerNorm (once per row tile) -> decoder matmul."""

    # Hidden state computed only on the first vocab tile; reused from VMEM
    # scratch for the remaining vocab tiles. Correct only while the vocab axis
    # is the innermost, sequentially iterated ("arbitrary") axis on one core.
    @pl.when(pl.program_id(1) == 0)
    def _():
        # Dense(E -> E) + bias: bf16 operands, f32 accumulation on the MXU.
        h = jnp.dot(x_ref[...], w1_ref[...], preferred_element_type=jnp.float32)
        h = h + b1_ref[...].astype(jnp.float32)
        g = _gelu(h)  # f32 VPU/EUP math
        # LayerNorm over the embedding axis (two-pass centered variance in f32).
        mean = jnp.mean(g, axis=-1, keepdims=True)
        cg = g - mean
        var = jnp.mean(cg * cg, axis=-1, keepdims=True)
        norm = cg * jax.lax.rsqrt(var + 1e-5)
        norm = norm * gamma_ref[...].astype(jnp.float32) + beta_ref[...].astype(jnp.float32)
        # Single cast to the decoder-weight dtype (bf16) for the big matmul.
        h_ref[...] = norm.astype(h_ref.dtype)

    # Decoder: Dense(E -> TV slab of V), bias=False, f32 accumulation, bf16 out.
    out_ref[...] = jnp.dot(
        h_ref[...], wdec_ref[...], preferred_element_type=jnp.float32
    ).astype(out_ref.dtype)


def init_params(key, embed_dim, vocab_size, dtype=jnp.float32):
    """Master (f32) parameters, stored as [in, out] (transposed vs torch Linear)."""
    ks = jax.random.split(key, 4)
    scale = 0.02
    return {
        # mlm: Linear(E, E) + GELU + LayerNorm(E)
        "w1": (scale * jax.random.normal(ks[0], (embed_dim, embed_dim))).astype(dtype),
        "b1": jnp.zeros((1, embed_dim), dtype),
        "gamma": jnp.ones((1, embed_dim), dtype),
        "beta": jnp.zeros((1, embed_dim), dtype),
        # mlm_decoder: Linear(E, V), bias=False
        "w_dec": (scale * jax.random.normal(ks[1], (embed_dim, vocab_size))).astype(dtype),
        # nsp_classifier: Linear(E, 2)
        "w_nsp": (scale * jax.random.normal(ks[2], (embed_dim, 2))).astype(dtype),
        "b_nsp": jnp.zeros((1, 2), dtype),
    }


def prepare_params(params, *, compute_dtype=jnp.bfloat16, vocab_tile=None):
    """One-time setup: cast MLM weights to the MXU dtype and pad w_dec's vocab
    dim to a multiple of the vocab tile (done ONCE here, never per call)."""
    if vocab_tile is None:
        vocab_tile = _device_defaults()["vocab_tile"]
    E, V = params["w_dec"].shape
    TV = min(vocab_tile, _round_up(V, 128))     # lane-dense output stores
    V_pad = _round_up(V, TV)
    w_dec = params["w_dec"].astype(compute_dtype)
    if V_pad != V:
        w_dec = jnp.pad(w_dec, ((0, 0), (0, V_pad - V)))
    return {
        "w1": params["w1"].astype(compute_dtype),
        "b1": params["b1"].astype(compute_dtype),
        "gamma": params["gamma"].astype(compute_dtype),
        "beta": params["beta"].astype(compute_dtype),
        "w_dec": w_dec,
        "w_nsp": params["w_nsp"],   # NSP stays in original dtype (plain XLA)
        "b_nsp": params["b_nsp"],
        "vocab_size": V,
        "vocab_tile": TV,
        "compute_dtype": compute_dtype,
    }


def _build_mlm_call(N_pad, E, V_pad, TM, TV, compute_dtype, out_dtype,
                    vmem_limit, wdec_buffers, use_pipeline_modes):
    if use_pipeline_modes:
        def const_spec(shape):
            # Constant index map -> single buffer; no point double-buffering a
            # resident w1 tile. Frees VMEM so TM/TV can grow (matters on v7x).
            return pl.BlockSpec(shape, lambda i, j: (0, 0),
                                pipeline_mode=pl.Buffered(1))
        wdec_kwargs = (dict(pipeline_mode=pl.Buffered(wdec_buffers))
                       if wdec_buffers != 2 else {})
        wdec_spec = pl.BlockSpec((E, TV), lambda i, j: (0, j), **wdec_kwargs)
    else:
        def const_spec(shape):
            return pl.BlockSpec(shape, lambda i, j: (0, 0))
        wdec_spec = pl.BlockSpec((E, TV), lambda i, j: (0, j))

    return pl.pallas_call(
        mlm_kernel,
        out_shape=jax.ShapeDtypeStruct((N_pad, V_pad), out_dtype),
        grid_spec=pltpu.PrefetchScalarGridSpec(
            num_scalar_prefetch=0,
            grid=(N_pad // TM, V_pad // TV),
            in_specs=[
                pl.BlockSpec((TM, E), lambda i, j: (i, 0)),   # x rows
                const_spec((E, E)),                           # w1 (resident)
                const_spec((1, E)),                           # b1
                const_spec((1, E)),                           # gamma
                const_spec((1, E)),                           # beta
                wdec_spec,                                     # w_dec vocab slab
            ],
            out_specs=pl.BlockSpec((TM, TV), lambda i, j: (i, j)),
            # Post-LayerNorm activations, reused across vocab tiles.
            scratch_shapes=[pltpu.VMEM((TM, E), compute_dtype)],
        ),
        compiler_params=pltpu.CompilerParams(
            dimension_semantics=("parallel", "arbitrary"),
            vmem_limit_bytes=vmem_limit,
        ),
    )


def bert_pretraining_head(seq_output, prepared, *, row_tile=None,
                          vmem_limit_bytes=None, out_dtype=None):
    """Forward pass matching BERT_Pretraining_Head. `prepared` = prepare_params(...)."""
    defaults = _device_defaults()
    row_tile = row_tile if row_tile is not None else defaults["row_tile"]
    vmem_limit = (vmem_limit_bytes if vmem_limit_bytes is not None
                  else defaults["vmem_limit"])
    wdec_buffers = defaults["wdec_buffers"]

    compute_dtype = prepared["compute_dtype"]
    out_dtype = out_dtype if out_dtype is not None else compute_dtype  # bf16 logits

    B, S, E = seq_output.shape
    V = prepared["vocab_size"]
    V_pad = prepared["w_dec"].shape[1]
    TV = prepared["vocab_tile"]
    assert V_pad % TV == 0

    N = B * S
    x = seq_output.reshape(N, E).astype(compute_dtype)   # bf16 MXU operand

    # Row tile: 16-aligned (bf16 packs 2 rows/sublane); keep >= 2 row tiles when
    # possible so both v7x TensorCores get work along the "parallel" rows axis.
    tm_align = 16 if compute_dtype == jnp.bfloat16 else 8
    TM = min(row_tile, _round_up(N, tm_align))
    TM = _round_up(TM, tm_align)
    while TM > 256 and (N + TM - 1) // TM < 2:
        TM = _round_up(TM // 2, tm_align)
    N_pad = _round_up(N, TM)
    if N_pad != N:
        x = jnp.pad(x, ((0, N_pad - N), (0, 0)))

    args = (x, prepared["w1"], prepared["b1"], prepared["gamma"],
            prepared["beta"], prepared["w_dec"])
    try:
        mlm_flat = _build_mlm_call(N_pad, E, V_pad, TM, TV, compute_dtype,
                                   out_dtype, vmem_limit, wdec_buffers,
                                   use_pipeline_modes=True)(*args)
    except Exception:
        # Fallback for jax versions without BlockSpec.pipeline_mode support.
        mlm_flat = _build_mlm_call(N_pad, E, V_pad, TM, TV, compute_dtype,
                                   out_dtype, vmem_limit, wdec_buffers,
                                   use_pipeline_modes=False)(*args)

    # TODO(synk): in production keep the padded vocab dim through the loss
    # (mask pad columns) instead of materializing this sliced N x V copy.
    mlm_logits = mlm_flat[:N, :V].reshape(B, S, V)

    # NSP head: [B, E] @ [E, 2] + bias. Lane width 2 makes a Pallas kernel pure
    # overhead (masked partial stores) -- leave this trivial matmul to XLA.
    cls = seq_output[:, 0, :]
    nsp_logits = cls @ prepared["w_nsp"] + prepared["b_nsp"][0]

    return mlm_logits, nsp_logits


def _reference(seq_output, params):
    x = seq_output.astype(jnp.float32)
    h = x @ params["w1"].astype(jnp.float32) + params["b1"][0].astype(jnp.float32)
    g = _gelu(h)
    mean = jnp.mean(g, axis=-1, keepdims=True)
    var = jnp.mean((g - mean) ** 2, axis=-1, keepdims=True)
    norm = (g - mean) / jnp.sqrt(var + 1e-5)
    norm = norm * params["gamma"][0].astype(jnp.float32) + params["beta"][0].astype(jnp.float32)
    mlm_logits = norm @ params["w_dec"].astype(jnp.float32)
    nsp_logits = (
        seq_output[:, 0, :].astype(jnp.float32) @ params["w_nsp"].astype(jnp.float32)
        + params["b_nsp"][0].astype(jnp.float32)
    )
    return mlm_logits, nsp_logits


if __name__ == "__main__":
    # Small shapes; V=160 exercises vocab padding, vocab_tile=128 gives two vocab
    # tiles per row tile so the scratch-reuse path is exercised.
    B, S, E, V = 2, 8, 32, 160
    key = jax.random.PRNGKey(0)
    k_x, k_p = jax.random.split(key)
    seq_output = jax.random.normal(k_x, (B, S, E), dtype=jnp.float32)
    params = init_params(k_p, E, V)

    prepared = prepare_params(params, compute_dtype=jnp.bfloat16, vocab_tile=128)
    mlm_logits, nsp_logits = bert_pretraining_head(seq_output, prepared, row_tile=256)
    jax.block_until_ready((mlm_logits, nsp_logits))

    ref_mlm, ref_nsp = _reference(seq_output, params)
    assert mlm_logits.shape == (B, S, V) and nsp_logits.shape == (B, 2)
    # bf16 MXU operands + bf16 logits -> loose tolerance vs the f32 reference.
    assert jnp.allclose(mlm_logits.astype(jnp.float32), ref_mlm, rtol=5e-2, atol=1e-2)
    assert jnp.allclose(nsp_logits.astype(jnp.float32), ref_nsp, rtol=1e-3, atol=1e-3)

    print("KERNEL_OK")
</pallas_src>

<mosaic_0001>
module attributes {stable_mosaic.version = 11 : i64} {
  func.func @mlm_kernel(%arg0: i32, %arg1: i32, %arg2: memref<16x32xbf16, #tpu.memory_space<vmem>>, %arg3: memref<32x32xbf16, #tpu.memory_space<vmem>>, %arg4: memref<1x32xbf16, #tpu.memory_space<vmem>>, %arg5: memref<1x32xbf16, #tpu.memory_space<vmem>>, %arg6: memref<1x32xbf16, #tpu.memory_space<vmem>>, %arg7: memref<32x128xbf16, #tpu.memory_space<vmem>>, %arg8: memref<16x128xbf16, #tpu.memory_space<vmem>>, %arg9: memref<16x32xbf16, #tpu.memory_space<vmem>>) attributes {dimension_semantics = [#tpu.dimension_semantics<parallel>, #tpu.dimension_semantics<arbitrary>], iteration_bounds = array<i64: 1, 2>, scalar_prefetch = 0 : i64, scratch_operands = 1 : i64, tpu.core_type = #tpu.core_type<tc>, window_params = [{transform_indices = @transform_0, window_bounds = array<i64: 16, 32>}, {pipeline_mode = #tpu.pipeline_mode<synchronous>, transform_indices = @transform_1, window_bounds = array<i64: 32, 32>}, {pipeline_mode = #tpu.pipeline_mode<synchronous>, transform_indices = @transform_2, window_bounds = array<i64: 1, 32>}, {pipeline_mode = #tpu.pipeline_mode<synchronous>, transform_indices = @transform_3, window_bounds = array<i64: 1, 32>}, {pipeline_mode = #tpu.pipeline_mode<synchronous>, transform_indices = @transform_4, window_bounds = array<i64: 1, 32>}, {transform_indices = @transform_5, window_bounds = array<i64: 32, 128>}, {transform_indices = @transform_6, window_bounds = array<i64: 16, 128>}]} {
    %c0_i32 = arith.constant 0 : i32
    %0 = arith.cmpi eq, %arg1, %c0_i32 : i32
    %1 = arith.extui %0 : i1 to i32
    %c0_i32_0 = arith.constant 0 : i32
    %2 = arith.cmpi ne, %1, %c0_i32_0 : i32
    scf.if %2 {
      %c0_6 = arith.constant 0 : index
      %c0_7 = arith.constant 0 : index
      %8 = vector.load %arg2[%c0_6, %c0_7] : memref<16x32xbf16, #tpu.memory_space<vmem>>, vector<16x32xbf16>
      %c0_8 = arith.constant 0 : index
      %c0_9 = arith.constant 0 : index
      %9 = vector.load %arg3[%c0_8, %c0_9] : memref<32x32xbf16, #tpu.memory_space<vmem>>, vector<32x32xbf16>
      %cst_10 = arith.constant dense<0.000000e+00> : vector<16x32xf32>
      %10 = tpu.matmul %8, %9, %cst_10 {dimension_numbers = #tpu.dot_dimension_numbers<[1], [0], [0], [1], [0, 0, 1, 1], [], []>} : vector<16x32xbf16>, vector<32x32xbf16>, vector<16x32xf32> -> vector<16x32xf32>
      %c0_11 = arith.constant 0 : index
      %c0_12 = arith.constant 0 : index
      %11 = vector.load %arg4[%c0_11, %c0_12] : memref<1x32xbf16, #tpu.memory_space<vmem>>, vector<1x32xbf16>
      %12 = arith.extf %11 : vector<1x32xbf16> to vector<1x32xf32>
      %13 = vector.broadcast %12 : vector<1x32xf32> to vector<16x32xf32>
      %14 = arith.addf %10, %13 : vector<16x32xf32>
      %cst_13 = arith.constant 5.000000e-01 : f32
      %15 = vector.broadcast %cst_13 : f32 to vector<16x32xf32>
      %16 = arith.mulf %15, %14 : vector<16x32xf32>
      %cst_14 = arith.constant 4.471500e-02 : f32
      %17 = vector.broadcast %cst_14 : f32 to vector<16x32xf32>
      %18 = arith.mulf %17, %14 : vector<16x32xf32>
      %19 = arith.mulf %18, %14 : vector<16x32xf32>
      %20 = arith.mulf %19, %14 : vector<16x32xf32>
      %21 = arith.addf %14, %20 : vector<16x32xf32>
      %cst_15 = arith.constant 0.797884583 : f32
      %22 = vector.broadcast %cst_15 : f32 to vector<16x32xf32>
      %23 = arith.mulf %22, %21 : vector<16x32xf32>
      %24 = math.tanh %23 : vector<16x32xf32>
      %cst_16 = arith.constant 1.000000e+00 : f32
      %25 = vector.broadcast %cst_16 : f32 to vector<16x32xf32>
      %26 = arith.addf %25, %24 : vector<16x32xf32>
      %27 = arith.mulf %16, %26 : vector<16x32xf32>
      %cst_17 = arith.constant dense<0.000000e+00> : vector<16xf32>
      %28 = vector.multi_reduction <add>, %27, %cst_17 [1] : vector<16x32xf32> to vector<16xf32>
      %29 = vector.shape_cast %28 : vector<16xf32> to vector<16x1xf32>
      %cst_18 = arith.constant 3.200000e+01 : f32
      %30 = vector.broadcast %cst_18 : f32 to vector<16x1xf32>
      %31 = arith.divf %29, %30 : vector<16x1xf32>
      %32 = vector.broadcast %31 : vector<16x1xf32> to vector<16x32xf32>
      %33 = arith.subf %27, %32 : vector<16x32xf32>
      %34 = arith.mulf %33, %33 : vector<16x32xf32>
      %cst_19 = arith.constant dense<0.000000e+00> : vector<16xf32>
      %35 = vector.multi_reduction <add>, %34, %cst_19 [1] : vector<16x32xf32> to vector<16xf32>
      %36 = vector.shape_cast %35 : vector<16xf32> to vector<16x1xf32>
      %cst_20 = arith.constant 3.200000e+01 : f32
      %37 = vector.broadcast %cst_20 : f32 to vector<16x1xf32>
      %38 = arith.divf %36, %37 : vector<16x1xf32>
      %cst_21 = arith.constant 9.99999974E-6 : f32
      %39 = vector.broadcast %cst_21 : f32 to vector<16x1xf32>
      %40 = arith.addf %38, %39 : vector<16x1xf32>
      %41 = math.rsqrt %40 : vector<16x1xf32>
      %42 = vector.broadcast %41 : vector<16x1xf32> to vector<16x32xf32>
      %43 = arith.mulf %33, %42 : vector<16x32xf32>
      %c0_22 = arith.constant 0 : index
      %c0_23 = arith.constant 0 : index
      %44 = vector.load %arg5[%c0_22, %c0_23] : memref<1x32xbf16, #tpu.memory_space<vmem>>, vector<1x32xbf16>
      %45 = arith.extf %44 : vector<1x32xbf16> to vector<1x32xf32>
      %46 = vector.broadcast %45 : vector<1x32xf32> to vector<16x32xf32>
      %47 = arith.mulf %43, %46 : vector<16x32xf32>
      %c0_24 = arith.constant 0 : index
      %c0_25 = arith.constant 0 : index
      %48 = vector.load %arg6[%c0_24, %c0_25] : memref<1x32xbf16, #tpu.memory_space<vmem>>, vector<1x32xbf16>
      %49 = arith.extf %48 : vector<1x32xbf16> to vector<1x32xf32>
      %50 = vector.broadcast %49 : vector<1x32xf32> to vector<16x32xf32>
      %51 = arith.addf %47, %50 : vector<16x32xf32>
      %52 = arith.truncf %51 : vector<16x32xf32> to vector<16x32xbf16>
      %c0_26 = arith.constant 0 : index
      %c0_27 = arith.constant 0 : index
      %53 = vector.load %arg9[%c0_26, %c0_27] : memref<16x32xbf16, #tpu.memory_space<vmem>>, vector<16x32xbf16>
      tpu.vector_store %arg9[%c0_26, %c0_27], %52 {strides = array<i32>} : memref<16x32xbf16, #tpu.memory_space<vmem>>, vector<16x32xbf16>,
    } else {
    }
    %c0 = arith.constant 0 : index
    %c0_1 = arith.constant 0 : index
    %3 = vector.load %arg9[%c0, %c0_1] : memref<16x32xbf16, #tpu.memory_space<vmem>>, vector<16x32xbf16>
    %c0_2 = arith.constant 0 : index
    %c0_3 = arith.constant 0 : index
    %4 = vector.load %arg7[%c0_2, %c0_3] : memref<32x128xbf16, #tpu.memory_space<vmem>>, vector<32x128xbf16>
    %cst = arith.constant dense<0.000000e+00> : vector<16x128xf32>
    %5 = tpu.matmul %3, %4, %cst {dimension_numbers = #tpu.dot_dimension_numbers<[1], [0], [0], [1], [0, 0, 1, 1], [], []>} : vector<16x32xbf16>, vector<32x128xbf16>, vector<16x128xf32> -> vector<16x128xf32>
    %6 = arith.truncf %5 : vector<16x128xf32> to vector<16x128xbf16>
    %c0_4 = arith.constant 0 : index
    %c0_5 = arith.constant 0 : index
    %7 = vector.load %arg8[%c0_4, %c0_5] : memref<16x128xbf16, #tpu.memory_space<vmem>>, vector<16x128xbf16>
    tpu.vector_store %arg8[%c0_4, %c0_5], %6 {strides = array<i32>} : memref<16x128xbf16, #tpu.memory_space<vmem>>, vector<16x128xbf16>,
    return
  }
  func.func @transform_0(%arg0: i32, %arg1: i32) -> (i32, i32) {
    %c0_i32 = arith.constant 0 : i32
    %c0_i32_0 = arith.constant 0 : i32
    return %arg0, %c0_i32 : i32, i32
  }
  func.func @transform_1(%arg0: i32, %arg1: i32) -> (i32, i32) {
    %c0_i32 = arith.constant 0 : i32
    %c0_i32_0 = arith.constant 0 : i32
    %c0_i32_1 = arith.constant 0 : i32
    return %c0_i32, %c0_i32_0 : i32, i32
  }
  func.func @transform_2(%arg0: i32, %arg1: i32) -> (i32, i32) {
    %c0_i32 = arith.constant 0 : i32
    %c0_i32_0 = arith.constant 0 : i32
    %c0_i32_1 = arith.constant 0 : i32
    return %c0_i32, %c0_i32_0 : i32, i32
  }
  func.func @transform_3(%arg0: i32, %arg1: i32) -> (i32, i32) {
    %c0_i32 = arith.constant 0 : i32
    %c0_i32_0 = arith.constant 0 : i32
    %c0_i32_1 = arith.constant 0 : i32
    return %c0_i32, %c0_i32_0 : i32, i32
  }
  func.func @transform_4(%arg0: i32, %arg1: i32) -> (i32, i32) {
    %c0_i32 = arith.constant 0 : i32
    %c0_i32_0 = arith.constant 0 : i32
    %c0_i32_1 = arith.constant 0 : i32
    return %c0_i32, %c0_i32_0 : i32, i32
  }
  func.func @transform_5(%arg0: i32, %arg1: i32) -> (i32, i32) {
    %c0_i32 = arith.constant 0 : i32
    %c0_i32_0 = arith.constant 0 : i32
    return %c0_i32, %arg1 : i32, i32
  }
  func.func @transform_6(%arg0: i32, %arg1: i32) -> (i32, i32) {
    %c0_i32 = arith.constant 0 : i32
    return %arg0, %arg1 : i32, i32
  }
}

module attributes {stable_mosaic.version = 11 : i64} {
  func.func @mlm_kernel(%arg0: i32, %arg1: i32, %arg2: memref<16x32xbf16, #tpu.memory_space<vmem>>, %arg3: memref<32x32xbf16, #tpu.memory_space<vmem>>, %arg4: memref<1x32xbf16, #tpu.memory_space<vmem>>, %arg5: memref<1x32xbf16, #tpu.memory_space<vmem>>, %arg6: memref<1x32xbf16, #tpu.memory_space<vmem>>, %arg7: memref<32x128xbf16, #tpu.memory_space<vmem>>, %arg8: memref<16x128xbf16, #tpu.memory_space<vmem>>, %arg9: memref<16x32xbf16, #tpu.memory_space<vmem>>) attributes {dimension_semantics = [#tpu.dimension_semantics<parallel>, #tpu.dimension_semantics<arbitrary>], iteration_bounds = array<i64: 1, 2>, scalar_prefetch = 0 : i64, scratch_operands = 1 : i64, tpu.core_type = #tpu.core_type<tc>, window_params = [{transform_indices = @transform_0, window_bounds = array<i64: 16, 32>}, {pipeline_mode = #tpu.pipeline_mode<synchronous>, transform_indices = @transform_1, window_bounds = array<i64: 32, 32>}, {pipeline_mode = #tpu.pipeline_mode<synchronous>, transform_indices = @transform_2, window_bounds = array<i64: 1, 32>}, {pipeline_mode = #tpu.pipeline_mode<synchronous>, transform_indices = @transform_3, window_bounds = array<i64: 1, 32>}, {pipeline_mode = #tpu.pipeline_mode<synchronous>, transform_indices = @transform_4, window_bounds = array<i64: 1, 32>}, {transform_indices = @transform_5, window_bounds = array<i64: 32, 128>}, {transform_indices = @transform_6, window_bounds = array<i64: 16, 128>}]} {
    %c0_i32 = arith.constant 0 : i32
    %0 = arith.cmpi eq, %arg1, %c0_i32 : i32
    %1 = arith.extui %0 : i1 to i32
    %c0_i32_0 = arith.constant 0 : i32
    %2 = arith.cmpi ne, %1, %c0_i32_0 : i32
    scf.if %2 {
      %c0_6 = arith.constant 0 : index
      %c0_7 = arith.constant 0 : index
      %8 = vector.load %arg2[%c0_6, %c0_7] : memref<16x32xbf16, #tpu.memory_space<vmem>>, vector<16x32xbf16>
      %c0_8 = arith.constant 0 : index
      %c0_9 = arith.constant 0 : index
      %9 = vector.load %arg3[%c0_8, %c0_9] : memref<32x32xbf16, #tpu.memory_space<vmem>>, vector<32x32xbf16>
      %cst_10 = arith.constant dense<0.000000e+00> : vector<16x32xf32>
      %10 = tpu.matmul %8, %9, %cst_10 {dimension_numbers = #tpu.dot_dimension_numbers<[1], [0], [0], [1], [0, 0, 1, 1], [], []>} : vector<16x32xbf16>, vector<32x32xbf16>, vector<16x32xf32> -> vector<16x32xf32>
      %c0_11 = arith.constant 0 : index
      %c0_12 = arith.constant 0 : index
      %11 = vector.load %arg4[%c0_11, %c0_12] : memref<1x32xbf16, #tpu.memory_space<vmem>>, vector<1x32xbf16>
      %12 = arith.extf %11 : vector<1x32xbf16> to vector<1x32xf32>
      %13 = vector.broadcast %12 : vector<1x32xf32> to vector<16x32xf32>
      %14 = arith.addf %10, %13 : vector<16x32xf32>
      %cst_13 = arith.constant 5.000000e-01 : f32
      %15 = vector.broadcast %cst_13 : f32 to vector<16x32xf32>
      %16 = arith.mulf %15, %14 : vector<16x32xf32>
      %cst_14 = arith.constant 4.471500e-02 : f32
      %17 = vector.broadcast %cst_14 : f32 to vector<16x32xf32>
      %18 = arith.mulf %17, %14 : vector<16x32xf32>
      %19 = arith.mulf %18, %14 : vector<16x32xf32>
      %20 = arith.mulf %19, %14 : vector<16x32xf32>
      %21 = arith.addf %14, %20 : vector<16x32xf32>
      %cst_15 = arith.constant 0.797884583 : f32
      %22 = vector.broadcast %cst_15 : f32 to vector<16x32xf32>
      %23 = arith.mulf %22, %21 : vector<16x32xf32>
      %24 = math.tanh %23 : vector<16x32xf32>
      %cst_16 = arith.constant 1.000000e+00 : f32
      %25 = vector.broadcast %cst_16 : f32 to vector<16x32xf32>
      %26 = arith.addf %25, %24 : vector<16x32xf32>
      %27 = arith.mulf %16, %26 : vector<16x32xf32>
      %cst_17 = arith.constant dense<0.000000e+00> : vector<16xf32>
      %28 = vector.multi_reduction <add>, %27, %cst_17 [1] : vector<16x32xf32> to vector<16xf32>
      %29 = vector.shape_cast %28 : vector<16xf32> to vector<16x1xf32>
      %cst_18 = arith.constant 3.200000e+01 : f32
      %30 = vector.broadcast %cst_18 : f32 to vector<16x1xf32>
      %31 = arith.divf %29, %30 : vector<16x1xf32>
      %32 = vector.broadcast %31 : vector<16x1xf32> to vector<16x32xf32>
      %33 = arith.subf %27, %32 : vector<16x32xf32>
      %34 = arith.mulf %33, %33 : vector<16x32xf32>
      %cst_19 = arith.constant dense<0.000000e+00> : vector<16xf32>
      %35 = vector.multi_reduction <add>, %34, %cst_19 [1] : vector<16x32xf32> to vector<16xf32>
      %36 = vector.shape_cast %35 : vector<16xf32> to vector<16x1xf32>
      %cst_20 = arith.constant 3.200000e+01 : f32
      %37 = vector.broadcast %cst_20 : f32 to vector<16x1xf32>
      %38 = arith.divf %36, %37 : vector<16x1xf32>
      %cst_21 = arith.constant 9.99999974E-6 : f32
      %39 = vector.broadcast %cst_21 : f32 to vector<16x1xf32>
      %40 = arith.addf %38, %39 : vector<16x1xf32>
      %41 = math.rsqrt %40 : vector<16x1xf32>
      %42 = vector.broadcast %41 : vector<16x1xf32> to vector<16x32xf32>
      %43 = arith.mulf %33, %42 : vector<16x32xf32>
      %c0_22 = arith.constant 0 : index
      %c0_23 = arith.constant 0 : index
      %44 = vector.load %arg5[%c0_22, %c0_23] : memref<1x32xbf16, #tpu.memory_space<vmem>>, vector<1x32xbf16>
      %45 = arith.extf %44 : vector<1x32xbf16> to vector<1x32xf32>
      %46 = vector.broadcast %45 : vector<1x32xf32> to vector<16x32xf32>
      %47 = arith.mulf %43, %46 : vector<16x32xf32>
      %c0_24 = arith.constant 0 : index
      %c0_25 = arith.constant 0 : index
      %48 = vector.load %arg6[%c0_24, %c0_25] : memref<1x32xbf16, #tpu.memory_space<vmem>>, vector<1x32xbf16>
      %49 = arith.extf %48 : vector<1x32xbf16> to vector<1x32xf32>
      %50 = vector.broadcast %49 : vector<1x32xf32> to vector<16x32xf32>
      %51 = arith.addf %47, %50 : vector<16x32xf32>
      %52 = arith.truncf %51 : vector<16x32xf32> to vector<16x32xbf16>
      %c0_26 = arith.constant 0 : index
      %c0_27 = arith.constant 0 : index
      %53 = vector.load %arg9[%c0_26, %c0_27] : memref<16x32xbf16, #tpu.memory_space<vmem>>, vector<16x32xbf16>
      tpu.vector_store %arg9[%c0_26, %c0_27], %52 {strides = array<i32>} : memref<16x32xbf16, #tpu.memory_space<vmem>>, vector<16x32xbf16>,
    } else {
    }
    %c0 = arith.constant 0 : index
    %c0_1 = arith.constant 0 : index
    %3 = vector.load %arg9[%c0, %c0_1] : memref<16x32xbf16, #tpu.memory_space<vmem>>, vector<16x32xbf16>
    %c0_2 = arith.constant 0 : index
    %c0_3 = arith.constant 0 : index
    %4 = vector.load %arg7[%c0_2, %c0_3] : memref<32x128xbf16, #tpu.memory_space<vmem>>, vector<32x128xbf16>
    %cst = arith.constant dense<0.000000e+00> : vector<16x128xf32>
    %5 = tpu.matmul %3, %4, %cst {dimension_numbers = #tpu.dot_dimension_numbers<[1], [0], [0], [1], [0, 0, 1, 1], [], []>} : vector<16x32xbf16>, vector<32x128xbf16>, vector<16x128xf32> -> vector<16x128xf32>
    %6 = arith.truncf %5 : vector<16x128xf32> to vector<16x128xbf16>
    %c0_4 = arith.constant 0 : index
    %c0_5 = arith.constant 0 : index
    %7 = vector.load %arg8[%c0_4, %c0_5] : memref<16x128xbf16, #tpu.memory_space<vmem>>, vector<16x128xbf16>
    tpu.vector_store %arg8[%c0_4, %c0_5], %6 {strides = array<i32>} : memref<16x128xbf16, #tpu.memory_space<vmem>>, vector<16x128xbf16>,
    return
  }
  func.func @transform_0(%arg0: i32, %arg1: i32) -> (i32, i32) {
    %c0_i32 = arith.constant 0 : i32
    %c0_i32_0 = arith.constant 0 : i32
    return %arg0, %c0_i32 : i32, i32
  }
  func.func @transform_1(%arg0: i32, %arg1: i32) -> (i32, i32) {
    %c0_i32 = arith.constant 0 : i32
    %c0_i32_0 = arith.constant 0 : i32
    %c0_i32_1 = arith.constant 0 : i32
    return %c0_i32, %c0_i32_0 : i32, i32
  }
  func.func @transform_2(%arg0: i32, %arg1: i32) -> (i32, i32) {
    %c0_i32 = arith.constant 0 : i32
    %c0_i32_0 = arith.constant 0 : i32
    %c0_i32_1 = arith.constant 0 : i32
    return %c0_i32, %c0_i32_0 : i32, i32
  }
  func.func @transform_3(%arg0: i32, %arg1: i32) -> (i32, i32) {
    %c0_i32 = arith.constant 0 : i32
    %c0_i32_0 = arith.constant 0 : i32
    %c0_i32_1 = arith.constant 0 : i32
    return %c0_i32, %c0_i32_0 : i32, i32
  }
  func.func @transform_4(%arg0: i32, %arg1: i32) -> (i32, i32) {
    %c0_i32 = arith.constant 0 : i32
    %c0_i32_0 = arith.constant 0 : i32
    %c0_i32_1 = arith.constant 0 : i32
    return %c0_i32, %c0_i32_0 : i32, i32
  }
  func.func @transform_5(%arg0: i32, %arg1: i32) -> (i32, i32) {
    %c0_i32 = arith.constant 0 : i32
    %c0_i32_0 = arith.constant 0 : i32
    return %c0_i32, %arg1 : i32, i32
  }
  func.func @transform_6(%arg0: i32, %arg1: i32) -> (i32, i32) {
    %c0_i32 = arith.constant 0 : i32
    return %arg0, %arg1 : i32, i32
  }
}

</mosaic_0001>

<bundles_post_ra>
// kernel: tpu_custom_call.1
= control target key start
LH: loop header
LB: loop body
LE: loop exit
PB: predicated region body
PF: predicated region fallthrough
CT: control target
= control target key end

     0   :  { %s1281_s0 = inlined_call_operand.hbm [shape: bf16[16,32], index: 0, kind: input, shape index: {}]   ;;  %s1282_s1 = inlined_call_operand.hbm [shape: bf16[32,32], index: 1, kind: input, shape index: {}]   ;;  %s1283_s2 = inlined_call_operand.vmem [shape: bf16[1,32], index: 2, kind: input, shape index: {}]   ;;  %s1284_s3 = inlined_call_operand.vmem [shape: bf16[1,32], index: 3, kind: input, shape index: {}]   ;;  %s1285_s4 = inlined_call_operand.vmem [shape: bf16[1,32], index: 4, kind: input, shape index: {}]   ;;  %s1286_s5 = inlined_call_operand.hbm [shape: bf16[32,256], index: 5, kind: input, shape index: {}]   ;;  %s1287_s6 = inlined_call_operand.hbm [shape: bf16[16,256], index: 6, kind: output, shape index: {}]  }
   0x1   :  { %1295 = sst [smem:[#allocation16_spill]] %s1281_s0 }
   0x2   :  { %1296 = sst [smem:[#allocation17_spill]] %s1282_s1 }
   0x3   :  { %11 = vsyncpa [#allocation4], 0 }
   0x4   :  { %12 = vsyncpa [#allocation7], 0 }
   0x5   :  { %13 = vsyncpa [#allocation5], 0 }
   0x6   :  { %15 = vsyncpa [#allocation5 + $0x1], 0  ;;  %s1056_s21 = smov 0   ;;  %s1058_s22 = smov 0  }
   0x7   :  { %s1060_s23 = smov 0   ;;  %s1062_s24 = smov 0  }
   0x8   :  { %s1064_s25 = smov 0   ;;  %s1066_s26 = smov 0  }
   0x9 LB: > { %1297 = sst [smem:[#allocation14_spill]] %s1005_s26  ;;  %s1087_s27 = sadd.s32 4294967295, %s1005_s26   ;;  %s1005_s26 = sphi %s1066_s26, %s21_s26   ;;  %s1001_s25 = sphi %s1064_s25, %s1324_s25   ;;  %s997_s24 = sphi %s1062_s24, %s1323_s24   ;;  %s993_s23 = sphi %s1060_s23, %s1322_s23   ;;  %s989_s22 = sphi %s1058_s22, %s1321_s22   ;;  %s985_s21 = sphi %s1056_s21, %s1320_s21  }
   0xa   : > { %s670_s28 = sadd.s32 4294967294, %s1005_s26   ;;  %p157_p0 = scmp.ne.s32.totalorder %s993_s23, %s989_s22 }
   0xb   : > { %p158_p1 = scmp.eq.s32.totalorder %s1005_s26, 0  ;;  %p163_p2 = scmp.ne.s32.totalorder %s989_s22, %s985_s21 }
   0xc   : > { %p1288_p3 = scmp.eq.s32.totalorder %s1087_s27, 0  ;;  %p189_p4 = scmp.eq.s32.totalorder %s1087_s27, 1 }
   0xd   : > { %p1098_p5 = por %p158_p1, %p157_p0  ;;  %p195_p6 = scmp.eq.s32.totalorder %s670_s28, 1 }
   0xe   : > { %p1104_p7 = por %p1288_p3, %p163_p2  ;;  %p1108_p8 = por %p189_p4, %p157_p0 }
   0xf   : > { %p1112_p9 = por %p195_p6, %p163_p2  ;;  %p671_p10 = scmp.ge.s32.totalorder %s1005_s26, 1 }
  0x10   : > { %s1300_s8 = scalar_select %p1108_p8, 1, 0 }
  0x11   : > { %s1301_s9 = scalar_select %p1112_p9, 1, 0 }
  0x12   : > { %p202_p11 = scmp.lt.s32.totalorder %s1005_s26, 3  ;;  %s1007_s11 = smov [#allocation3]  }
  0x13   : > { %1302 = sst [smem:[#allocation15_spill]] %s1301_s9  ;;  %s217_s12 = sshll.u32 %s1007_s11, 4  ;;  %s218_s12 = int_to_ptr.vmem [resolvable:$true] %s217_s12 }
  0x14   : > { %p1118_p12 = pnand %p671_p10, %p202_p11  ;;  %p759_p1 = scmp.lt.s32.totalorder %s1005_s26, 2 }
  0x15   : > { %s1008_s14 = smov [#allocation6]   ;;  %s848_s17 = scalar_lea.vmem %s218_s12, 128 }
  0x16   : > { %p742_p13 = pneg %p1118_p12  ;;  %s230_s15 = sshll.u32 %s1008_s14, 4  ;;  %s231_s15 = int_to_ptr.vmem [resolvable:$true] %s230_s15 }
  0x17   : > { %p1134_p2 = pnand %p759_p1, %p1098_p5  ;;  %p849_p10 = scmp.ne.s32.totalorder %s218_s12, %s848_s17 }
  0x18   : > { %p1128_p4 = pnand %p742_p13, %p1288_p3  ;;  %p856_p0 = scmp.lt.s32.totalorder %s218_s12, %s218_s12 }
  0x19   : > { %p857_p3 = scmp.lt.s32.totalorder %s848_s17, %s848_s17 }
  0x1a   : > { %p839_p6 = pneg %p1128_p4 }
  0x1b   : > { %p858_p9 = por %p857_p3, %p856_p0 }
  0x1c   : > { %p851_p11 = pnand %p849_p10, %p839_p6 }
  0x1e   : > { %p852_p13 = pneg %p851_p11 }
  0x20   : > { %p859_p8 = pnand %p858_p9, %p852_p13 }
  0x22   : > { %862 = shalt.err (!%p859_p8)
}
  0x23   : > { %s1291_s18 = smov 64   ;;  %s1292_s19 = smov 4  }
  0x24   : > { %s1306_s0 = sld [smem:[#allocation16_spill]]  ;;  %s874_s30 = scalar_lea.vmem %s231_s15, 256 }
  0x25   : > { %p875_p5 = scmp.ne.s32.totalorder %s231_s15, %s874_s30  ;;  %p882_p9 = scmp.lt.s32.totalorder %s231_s15, %s231_s15 }
  0x26   : > { %p883_p8 = scmp.lt.s32.totalorder %s874_s30, %s874_s30 }
  0x27   : > { %p877_p1 = pnand %p875_p5, %p839_p6 }
  0x28   : > { %p884_p0 = por %p883_p8, %p882_p9 }
  0x29   : > { %p878_p3 = pneg %p877_p1 }
  0x2a   : > { %745 = dma.hbm_to_vmem [thread:$0]  (!%p1128_p4), %s1306_s0, 128, %s218_s12, [#allocation4], %s1291_s18, %s1291_s18, %s1292_s19  }
  0x2b   : > { %p885_p10 = pnand %p884_p0, %p878_p3 }
  0x2d   : > { %888 = shalt.err (!%p885_p10)
}
  0x2e   : > { %s1307_s1 = sld [smem:[#allocation17_spill]]  ;;  %s30_s12 = sadd.s32 1, %s1001_s25 }
  0x2f   : > { %s253_s17 = sand.u32 1, %s1005_s26   ;;  %p31_p6 = scmp.ge.s32.totalorder %s30_s12, 2 }
  0x30   : > { %s255_s20 = sand.u32 1, %s993_s23   ;;  %s676_s13 = sshll.u32 %s1001_s25, 6 }
  0x31   : > { %s1326_s12 = smov (%p31_p6, %s30_s12), 0  ;;  %s675_s28 = sshll.u32 %s255_s20, 4 }
  0x32   : > { %s262_s14 = scalar_lea.hbm %s1286_s5, %s676_s13  ;;  %s147_s29 = ssub.s32 %s1001_s25, %s1326_s12 }
  0x33   : > { %p148_p11 = scmp.eq.s32.totalorder %s147_s29, 0  ;;  %s257_s0 = scalar_lea.vmem [#allocation8], %s675_s28 }
  0x34   : > { %748 = dma.hbm_to_vmem [thread:$0]  (!%p1128_p4), %s1307_s1, 256, %s231_s15, [#allocation7], %s1291_s18, %s1291_s18, %s1292_s19  }
  0x35   : > { %s263_s9 = sshll.u32 %s257_s0, 4  ;;  %s1308_s15 = sadd.s32 1, %s993_s23  ;;  %s264_s9 = int_to_ptr.vmem [resolvable:$true] %s263_s9 }
  0x36   : > { %s1176_s18 = scalar_select %p148_p11, %s993_s23, %s1308_s15  }
  0x37   : > { %s254_s19 = scalar_lea.sflag [#allocation4], %s253_s17  ;;  %p891_p4 = pneg %p1134_p2 }
  0x38   : > { %s902_s1 = scalar_lea.vmem %s264_s9, 256  ;;  %s1011_s20 = smov [#allocation8]  }
  0x39   : > { %p903_p13 = scmp.ne.s32.totalorder %s264_s9, %s902_s1  ;;  %s907_s26 = sshll.u32 %s1011_s20, 4  ;;  %s908_s26 = int_to_ptr.vmem [resolvable:$false] %s907_s26 }
  0x3a   : > { %s909_s30 = scalar_lea.vmem %s908_s26, 512  ;;  %p910_p3 = scmp.lt.s32.totalorder %s264_s9, %s908_s26 }
  0x3b   : > { %p905_p5 = pnand %p903_p13, %p891_p4  ;;  %p911_p9 = scmp.lt.s32.totalorder %s909_s30, %s902_s1 }
  0x3d   : > { %p906_p1 = pneg %p905_p5  ;;  %p912_p8 = por %p911_p9, %p910_p3 }
  0x3f   : > { %p913_p0 = pnand %p912_p8, %p906_p1 }
  0x41   : > { %916 = shalt.err (!%p913_p0)
}
  0x42   : > { %s1012_s0 = smov 128   ;;  %s1309_s29 = smov 4  }
  0x43   : > { %s1310_s17 = smov 64   ;;  %275 = sbr.rel (%p1118_p12) target bundleno = 858 (0x35a), region = 44 }
  0x44   : > { %752 = dma.hbm_to_vmem [thread:$0]  (!%p1134_p2), %s262_s14, 256, %s264_s9, %s254_s19, %s1012_s0, %s1310_s17, %s1309_s29  }
  0x45   : > { %p1311_p10 = scmp.eq.s32.totalorder (!%p1118_p12), %s1087_s27, 0 }
  0x48   : > { %968 = dma.done.wait (%p1311_p10), [#allocation4], 128   ;;  %p1312_p6 = pmov %p1311_p10 }
  0x4a   : > { %970 = vsyncadd (%p1312_p6), [#allocation4], 4294967168  ;;  %p1313_p11 = pmov %p1312_p6 }
  0x4b   : > { %p1314_p4 = pmov %p1312_p6 }
  0x4c   : > { %972 = dma.done.wait (%p1313_p11), [#allocation7], 256  }
  0x4d   : > { %974 = vsyncadd (%p1314_p4), [#allocation7], 4294967040  ;;  %s285_s1 = sand.u32 1, %s1087_s27   ;;  %s1196_s26 = sand.u32 1, %s989_s22  }
  0x4e   : > { %s680_s9 = sshll.u32 %s1196_s26, 4  ;;  %s286_s10 = scalar_lea.sflag [#allocation4], %s285_s1 }
  0x4f   : > { %s1199_s16 = scalar_lea.vmem [#allocation8], %s680_s9 }
  0x50   : > { %976 = dma.done.wait (%p1104_p7), %s286_s10, 256  }
  0x51   : > { %978 = vsyncadd (%p1104_p7), %s286_s10, 4294967040  ;;  %s681_s19 = sshll.u32 %s1196_s26, 3  ;;  %p682_p12 = scmp.ne.s32.totalorder %s997_s24, 0 }
  0x52   : > { %s1206_s13 = scalar_lea.vmem [#allocation9], %s681_s19 }
  0x53   : > { %324 = sbr.rel (%p682_p12) target bundleno = 635 (0x27b), region = 60 }
  0x58   : > { %v823_v0 = vld [vmem:[#allocation6 + $0x8] sm:$0xff]   ;;  %v1013_v1 = vmov 0.0   ;;  %v824_v2 = vld [vmem:[#allocation6] sm:$0xff]   ;;  %vm1014_vm0 = vmmov 0   ;;  %v825_v3 = vld [vmem:[#allocation3] sm:$0xff]   ;;  %vm354_vm1 = vcmask 261120   ;;  %v333_v4 = vlaneseq }
  0x59   : > { %714 = vmatprep.subr.bf16.mxu0 %v1013_v1  ;;  %718 = vmatprep.mubr.msk.bf16.mxu0 %vm1014_vm0, %v1013_v1  ;;  %v331_v6 = vld [vmem:[%s1283_s2] sm:$0x1]  ;;  %vm468_vm2 = vcmask 257024  }
  0x5a   : > { %715 = vmatpush3.bf16.msra.mxu0 %v823_v0  ;;  %v334_v5 = vshrl.u32 %v333_v4, 7  ;;  %v332_v7 = vunpack.c.l.bf16 %v331_v6  ;;  %v444_v52 = vld [vmem:[%s1284_s3] sm:$0x1] }
  0x5b   : > { %716 = vmatprep.subr.bf16.mxu0 %v1013_v1  ;;  %v452_v53 = vld [vmem:[%s1285_s4] sm:$0x1]  ;;  %v445_v54 = vunpack.c.l.bf16 %v444_v52 }
  0x5c   : > { %v335_v8 = vsub.s32 0, %v334_v5  ;;  %v453_v55 = vunpack.c.l.bf16 %v452_v53 }
  0x5e   : > { %717 = vmatpush3.bf16.msra.mxu0 %v824_v2  ;;  %v336_v9 = vrot.slane %v332_v7, %v335_v8  ;;  %v449_v56 = vrot.slane %v445_v54, %v335_v8  ;;  %v457_v58 = vrot.slane %v453_v55, %v335_v8 }
  0x61   : > { %719 = vmatmul.mubr.msk.bf16.vlgmr.msra.gmra.mxu0 %vm354_vm1, %v825_v3 }
 0x121   : > { %v392_v10 = vpop.f32.mrf.mxu0 }
 0x122   : > { %v393_v11 = vadd.f32 %v392_v10, %v336_v9 }
 0x123   : > { %v720_v12 = vpop.f32.mrf.mxu0 }
 0x124   : > { %v401_v13 = vmul.f32 0.044715, %v393_v11  ;;  %v399_v27 = vmul.f32 0.5, %v393_v11 }
 0x125   : > { %v395_v14 = vpop.f32.mrf.mxu0 }
 0x126   : > { %v396_v15 = vadd.f32 %v395_v14, %v336_v9  ;;  %v403_v16 = vmul.f32 %v401_v13, %v393_v11 }
 0x127   : > { %v721_v17 = vpop.f32.mrf.mxu0 }
 0x128   : > { %v402_v18 = vmul.f32 0.044715, %v396_v15  ;;  %v405_v19 = vmul.f32 %v403_v16, %v393_v11  ;;  %v400_v32 = vmul.f32 0.5, %v396_v15 }
 0x12a   : > { %v407_v20 = vadd.f32 %v405_v19, %v393_v11  ;;  %v404_v21 = vmul.f32 %v402_v18, %v396_v15 }
 0x12c   : > { %v409_v22 = vmul.f32 0.7978846, %v407_v20  ;;  %v406_v23 = vmul.f32 %v404_v21, %v396_v15 }
 0x12e   : > { %826 = vtanh.f32 %v409_v22  ;;  %v408_v24 = vadd.f32 %v406_v23, %v396_v15 }
 0x130   : > { %v410_v25 = vmul.f32 0.7978846, %v408_v24 }
 0x132   : > { %828 = vtanh.f32 %v410_v25 }
 0x13b   : > { %v827_v26 = vpop.eup %826 }
 0x13c   : > { %v413_v28 = vadd.f32 1.0, %v827_v26 }
 0x13e   : > { %v415_v29 = vmul.f32 %v413_v28, %v399_v27 }
 0x13f   : > { %v829_v30 = vpop.eup %828 }
 0x140   : > { %v417_v31 = vsel %vm354_vm1, %v415_v29, 0.0  ;;  %v414_v33 = vadd.f32 1.0, %v829_v30 }
 0x141   : > { %418 = vadd.xlane.f32.xlu0 %v417_v31 }
 0x142   : > { %v416_v34 = vmul.f32 %v414_v33, %v400_v32 }
 0x144   : > { %v420_v35 = vsel %vm354_vm1, %v416_v34, 0.0 }
 0x145   : > { %421 = vadd.xlane.f32.xlu0 %v420_v35 }
 0x1ca   : > { %v419_v36 = vpop.xlane.xlu0 %418 }
 0x1cb   : > { %v424_v37 = vmul.f32 0.03125, %v419_v36 }
 0x1cd   : > { %v426_v38 = vsub.f32 %v415_v29, %v424_v37 }
 0x1ce   : > { %v422_v39 = vpop.xlane.xlu0 %421 }
 0x1cf   : > { %v425_v40 = vmul.f32 0.03125, %v422_v39  ;;  %v428_v41 = vmul.f32 %v426_v38, %v426_v38 }
 0x1d1   : > { %v427_v42 = vsub.f32 %v416_v34, %v425_v40  ;;  %v430_v43 = vsel %vm354_vm1, %v428_v41, 0.0 }
 0x1d2   : > { %431 = vadd.xlane.f32.xlu1 %v430_v43 }
 0x1d3   : > { %v429_v44 = vmul.f32 %v427_v42, %v427_v42 }
 0x1d5   : > { %v433_v45 = vsel %vm354_vm1, %v429_v44, 0.0 }
 0x1d6   : > { %434 = vadd.xlane.f32.xlu1 %v433_v45 }
 0x25b   : > { %v432_v46 = vpop.xlane.xlu1 %431 }
 0x25c   : > { %v436_v47 = vmul.f32 0.03125, %v432_v46 }
 0x25e   : > { %v438_v48 = vadd.f32 1e-05, %v436_v47 }
 0x25f   : > { %v435_v49 = vpop.xlane.xlu1 %434 }
 0x260   : > { %830 = vrsqrt.f32 %v438_v48  ;;  %v437_v50 = vmul.f32 0.03125, %v435_v49 }
 0x262   : > { %v439_v51 = vadd.f32 1e-05, %v437_v50 }
 0x264   : > { %832 = vrsqrt.f32 %v439_v51 }
 0x26d   : > { %v831_v57 = vpop.eup %830 }
 0x26e   : > { %v442_v59 = vmul.f32 %v831_v57, %v426_v38 }
 0x270   : > { %v450_v60 = vmul.f32 %v449_v56, %v442_v59 }
 0x271   : > { %v833_v61 = vpop.eup %832 }
 0x272   : > { %v458_v62 = vadd.f32 %v457_v58, %v450_v60  ;;  %v443_v63 = vmul.f32 %v833_v61, %v427_v42 }
 0x274   : > { %v699_v0 = vpack.c.bf16 %v458_v62, %v458_v62  ;;  %v451_v1 = vmul.f32 %v449_v56, %v443_v63 }
 0x276   : > { %469 = vst.msk [vmem:[#allocation2] sm:$0xf] %vm468_vm2, %v699_v0  ;;  %v459_v2 = vadd.f32 %v457_v58, %v451_v1 }
 0x278   : > { %v700_v3 = vpack.c.bf16 %v459_v2, %v459_v2 }
 0x27a   : > { %470 = vst.msk [vmem:[#allocation2 + $0x4] sm:$0xf] %vm468_vm2, %v700_v3 }
 0x27b PF: > { %v834_v4 = vld [vmem:[%s1199_s16 + $0x8] sm:$0xff]   ;;  %v1015_v5 = vmov 0.0   ;;  %v835_v6 = vld [vmem:[%s1199_s16] sm:$0xff]   ;;  %vm1016_vm3 = vmmov 0   ;;  %vm494_vm4 = vcmask 261120   ;;  %s696_s20 = sshll.u32 %s997_s24, 6 }
 0x27c   : > { %722 = vmatprep.subr.bf16.mxu0 %v1015_v5  ;;  %726 = vmatprep.mubr.msk.bf16.mxu0 %vm1016_vm3, %v1015_v5  ;;  %s565_s30 = sshll.u32 %s1206_s13, 4  ;;  %s1230_s17 = scalar_lea.hbm %s1287_s6, %s696_s20  ;;  %s1232_s30 = int_to_ptr.vmem [resolvable:$true] %s565_s30 }
 0x27d   : > { %723 = vmatpush3.bf16.msra.mxu0 %v834_v4  ;;  %s550_s1 = scalar_lea.sflag [#allocation5], %s1196_s26  ;;  %s917_s9 = scalar_lea.vmem %s1232_s30, 128 }
 0x27e   : > { %724 = vmatprep.subr.bf16.mxu0 %v1015_v5  ;;  %p918_p7 = scmp.ne.s32.totalorder %s1232_s30, %s917_s9  ;;  %p1315_p2 = scmp.ne.s32.totalorder %s1300_s8, 0 }
 0x27f   : > { %s1017_s24 = smov [#allocation9]  }
 0x280   : > { %p919_p13 = pnand %p918_p7, %p1315_p2  ;;  %s921_s10 = sshll.u32 %s1017_s24, 4  ;;  %s922_s10 = int_to_ptr.vmem [resolvable:$false] %s921_s10 }
 0x281   : > { %v836_v7 = vld [vmem:[#allocation2] sm:$0xff]   ;;  %725 = vmatpush3.bf16.msra.mxu0 %v835_v6  ;;  %s923_s16 = scalar_lea.vmem %s922_s10, 256  ;;  %p924_p1 = scmp.lt.s32.totalorder %s1232_s30, %s922_s10 }
 0x282   : > { %p920_p5 = pneg %p919_p13  ;;  %p925_p3 = scmp.lt.s32.totalorder %s923_s16, %s917_s9 }
 0x284   : > { %727 = vmatmul.mubr.msk.bf16.vlgmr.msra.gmra.mxu0 %vm494_vm4, %v836_v7  ;;  %p926_p9 = por %p925_p3, %p924_p1 }
 0x286   : > { %p927_p8 = pnand %p926_p9, %p920_p5 }
 0x344   : > { %v532_v8 = vpop.f32.mrf.mxu0 }
 0x346   : > { %v728_v9 = vpop.f32.mrf.mxu0 }
 0x348   : > { %v535_v10 = vpop.f32.mrf.mxu0 }
 0x349   : > { %v706_v11 = vpack.c.bf16 %v535_v10, %v532_v8 }
 0x34a   : > { %v729_v12 = vpop.f32.mrf.mxu0 }
 0x34b   : > { %707 = vst [vmem:[%s1206_s13] sm:$0xff] %v706_v11  }
 0x34c   : > { %930 = shalt.err (!%p927_p8)
}
 0x34d   : > { %s931_s19 = scalar_lea.hbm %s1230_s17, 128  ;;  %s935_s7 = scalar_lea.hbm %s1287_s6, 256 }
 0x34e   : > { %p932_p0 = scmp.ne.s32.totalorder %s1230_s17, %s931_s19  ;;  %p936_p11 = scmp.lt.s32.totalorder %s1230_s17, %s1287_s6 }
 0x34f   : > { %p937_p4 = scmp.lt.s32.totalorder %s935_s7, %s931_s19 }
 0x350   : > { %p933_p10 = pnand %p932_p0, %p1315_p2 }
 0x351   : > { %p938_p12 = por %p937_p4, %p936_p11 }
 0x352   : > { %p934_p6 = pneg %p933_p10 }
 0x354   : > { %p939_p7 = pnand %p938_p12, %p934_p6 }
 0x356   : > { %942 = shalt.err (!%p939_p7)
}
 0x357   : > { %s1018_s14 = smov 64   ;;  %s1019_s15 = smov 128  }
 0x358   : > { %s1020_s20 = smov 4  }
 0x359   : > { %740 = dma.vmem_to_hbm [thread:$0]  (%p1315_p2), %s1232_s30, 128, %s1230_s17, %s550_s1, %s1018_s14, %s1019_s15, %s1020_s20  }
 0x35a PF: > { %s1316_s0 = sld [smem:[#allocation15_spill]]  ;;  %s580_s9 = sand.u32 1, %s985_s21  }
 0x35b   : > { %s1317_s29 = sld [smem:[#allocation14_spill]]  ;;  %s581_s24 = scalar_lea.sflag [#allocation5], %s580_s9 }
 0x360   : > { %p1318_p13 = scmp.ne.s32.totalorder %s1316_s0, 0 }
 0x361   : > { %p1319_p5 = scmp.ge.s32.totalorder %s1317_s29, 2 }
 0x363   : > { %p754_p1 = pnand %p1319_p5, %p1318_p13 }
 0x365   : > { %p755_p3 = pneg %p754_p1 }
 0x367   : > { %980 = dma.done.wait (%p755_p3), %s581_s24, 128  }
 0x368   : > { %982 = vsyncadd (%p755_p3), %s581_s24, 4294967168  ;;  %s21_s26 = sadd.s32 1, %s1317_s29   ;;  %s1320_s21 = smov %s989_s22 }
 0x369   : > { %p18_p9 = scmp.ge.s32.totalorder %s21_s26, 4   ;;  %s1321_s22 = smov %s993_s23 }
 0x36a   : > { %s1322_s23 = smov %s1176_s18  ;;  %s1323_s24 = smov %s1001_s25 }
 0x36b   : > { %s1324_s25 = smov %s1326_s12  ;;  %20 = sbr.rel (!%p18_p9) target bundleno = 9 (0x9), region = 101 }
 0x370   :  { %586 = vsyncpa [#allocation4], 1 }
 0x371   :  { %588 = vsyncpa [#allocation4 + $0x1], 1 }
 0x372   :  { %589 = vsyncpa [#allocation7], 1 }
 0x373   :  { %590 = vsyncpa [#allocation5], 1 }
 0x374   :  { %592 = vsyncpa [#allocation5 + $0x1], 1 }

// kernel: tpu_custom_call.1
= control target key start
LH: loop header
LB: loop body
LE: loop exit
PB: predicated region body
PF: predicated region fallthrough
CT: control target
= control target key end

     0   :  { %s1281_s0 = inlined_call_operand.hbm [shape: bf16[16,32], index: 0, kind: input, shape index: {}]   ;;  %s1282_s1 = inlined_call_operand.hbm [shape: bf16[32,32], index: 1, kind: input, shape index: {}]   ;;  %s1283_s2 = inlined_call_operand.vmem [shape: bf16[1,32], index: 2, kind: input, shape index: {}]   ;;  %s1284_s3 = inlined_call_operand.vmem [shape: bf16[1,32], index: 3, kind: input, shape index: {}]   ;;  %s1285_s4 = inlined_call_operand.vmem [shape: bf16[1,32], index: 4, kind: input, shape index: {}]   ;;  %s1286_s5 = inlined_call_operand.hbm [shape: bf16[32,256], index: 5, kind: input, shape index: {}]   ;;  %s1287_s6 = inlined_call_operand.hbm [shape: bf16[16,256], index: 6, kind: output, shape index: {}]  }
   0x1   :  { %1295 = sst [smem:[#allocation16_spill]] %s1281_s0 }
   0x2   :  { %1296 = sst [smem:[#allocation17_spill]] %s1282_s1 }
   0x3   :  { %11 = vsyncpa [#allocation4], 0 }
   0x4   :  { %12 = vsyncpa [#allocation7], 0 }
   0x5   :  { %13 = vsyncpa [#allocation5], 0 }
   0x6   :  { %15 = vsyncpa [#allocation5 + $0x1], 0  ;;  %s1056_s21 = smov 0   ;;  %s1058_s22 = smov 0  }
   0x7   :  { %s1060_s23 = smov 0   ;;  %s1062_s24 = smov 0  }
   0x8   :  { %s1064_s25 = smov 0   ;;  %s1066_s26 = smov 0  }
   0x9 LB: > { %1297 = sst [smem:[#allocation14_spill]] %s1005_s26  ;;  %s1087_s27 = sadd.s32 4294967295, %s1005_s26   ;;  %s1005_s26 = sphi %s1066_s26, %s21_s26   ;;  %s1001_s25 = sphi %s1064_s25, %s1324_s25   ;;  %s997_s24 = sphi %s1062_s24, %s1323_s24   ;;  %s993_s23 = sphi %s1060_s23, %s1322_s23   ;;  %s989_s22 = sphi %s1058_s22, %s1321_s22   ;;  %s985_s21 = sphi %s1056_s21, %s1320_s21  }
   0xa   : > { %s670_s28 = sadd.s32 4294967294, %s1005_s26   ;;  %p157_p0 = scmp.ne.s32.totalorder %s993_s23, %s989_s22 }
   0xb   : > { %p158_p1 = scmp.eq.s32.totalorder %s1005_s26, 0  ;;  %p163_p2 = scmp.ne.s32.totalorder %s989_s22, %s985_s21 }
   0xc   : > { %p1288_p3 = scmp.eq.s32.totalorder %s1087_s27, 0  ;;  %p189_p4 = scmp.eq.s32.totalorder %s1087_s27, 1 }
   0xd   : > { %p1098_p5 = por %p158_p1, %p157_p0  ;;  %p195_p6 = scmp.eq.s32.totalorder %s670_s28, 1 }
   0xe   : > { %p1104_p7 = por %p1288_p3, %p163_p2  ;;  %p1108_p8 = por %p189_p4, %p157_p0 }
   0xf   : > { %p1112_p9 = por %p195_p6, %p163_p2  ;;  %p671_p10 = scmp.ge.s32.totalorder %s1005_s26, 1 }
  0x10   : > { %s1300_s8 = scalar_select %p1108_p8, 1, 0 }
  0x11   : > { %s1301_s9 = scalar_select %p1112_p9, 1, 0 }
  0x12   : > { %p202_p11 = scmp.lt.s32.totalorder %s1005_s26, 3  ;;  %s1007_s11 = smov [#allocation3]  }
  0x13   : > { %1302 = sst [smem:[#allocation15_spill]] %s1301_s9  ;;  %s217_s12 = sshll.u32 %s1007_s11, 4  ;;  %s218_s12 = int_to_ptr.vmem [resolvable:$true] %s217_s12 }
  0x14   : > { %p1118_p12 = pnand %p671_p10, %p202_p11  ;;  %p759_p1 = scmp.lt.s32.totalorder %s1005_s26, 2 }
  0x15   : > { %s1008_s14 = smov [#allocation6]   ;;  %s848_s17 = scalar_lea.vmem %s218_s12, 128 }
  0x16   : > { %p742_p13 = pneg %p1118_p12  ;;  %s230_s15 = sshll.u32 %s1008_s14, 4  ;;  %s231_s15 = int_to_ptr.vmem [resolvable:$true] %s230_s15 }
  0x17   : > { %p1134_p2 = pnand %p759_p1, %p1098_p5  ;;  %p849_p10 = scmp.ne.s32.totalorder %s218_s12, %s848_s17 }
  0x18   : > { %p1128_p4 = pnand %p742_p13, %p1288_p3  ;;  %p856_p0 = scmp.lt.s32.totalorder %s218_s12, %s218_s12 }
  0x19   : > { %p857_p3 = scmp.lt.s32.totalorder %s848_s17, %s848_s17 }
  0x1a   : > { %p839_p6 = pneg %p1128_p4 }
  0x1b   : > { %p858_p9 = por %p857_p3, %p856_p0 }
  0x1c   : > { %p851_p11 = pnand %p849_p10, %p839_p6 }
  0x1e   : > { %p852_p13 = pneg %p851_p11 }
  0x20   : > { %p859_p8 = pnand %p858_p9, %p852_p13 }
  0x22   : > { %862 = shalt.err (!%p859_p8)
}
  0x23   : > { %s1291_s18 = smov 64   ;;  %s1292_s19 = smov 4  }
  0x24   : > { %s1306_s0 = sld [smem:[#allocation16_spill]]  ;;  %s874_s30 = scalar_lea.vmem %s231_s15, 256 }
  0x25   : > { %p875_p5 = scmp.ne.s32.totalorder %s231_s15, %s874_s30  ;;  %p882_p9 = scmp.lt.s32.totalorder %s231_s15, %s231_s15 }
  0x26   : > { %p883_p8 = scmp.lt.s32.totalorder %s874_s30, %s874_s30 }
  0x27   : > { %p877_p1 = pnand %p875_p5, %p839_p6 }
  0x28   : > { %p884_p0 = por %p883_p8, %p882_p9 }
  0x29   : > { %p878_p3 = pneg %p877_p1 }
  0x2a   : > { %745 = dma.hbm_to_vmem [thread:$0]  (!%p1128_p4), %s1306_s0, 128, %s218_s12, [#allocation4], %s1291_s18, %s1291_s18, %s1292_s19  }
  0x2b   : > { %p885_p10 = pnand %p884_p0, %p878_p3 }
  0x2d   : > { %888 = shalt.err (!%p885_p10)
}
  0x2e   : > { %s1307_s1 = sld [smem:[#allocation17_spill]]  ;;  %s30_s12 = sadd.s32 1, %s1001_s25 }
  0x2f   : > { %s253_s17 = sand.u32 1, %s1005_s26   ;;  %p31_p6 = scmp.ge.s32.totalorder %s30_s12, 2 }
  0x30   : > { %s255_s20 = sand.u32 1, %s993_s23   ;;  %s676_s13 = sshll.u32 %s1001_s25, 6 }
  0x31   : > { %s1326_s12 = smov (%p31_p6, %s30_s12), 0  ;;  %s675_s28 = sshll.u32 %s255_s20, 4 }
  0x32   : > { %s262_s14 = scalar_lea.hbm %s1286_s5, %s676_s13  ;;  %s147_s29 = ssub.s32 %s1001_s25, %s1326_s12 }
  0x33   : > { %p148_p11 = scmp.eq.s32.totalorder %s147_s29, 0  ;;  %s257_s0 = scalar_lea.vmem [#allocation8], %s675_s28 }
  0x34   : > { %748 = dma.hbm_to_vmem [thread:$0]  (!%p1128_p4), %s1307_s1, 256, %s231_s15, [#allocation7], %s1291_s18, %s1291_s18, %s1292_s19  }
  0x35   : > { %s263_s9 = sshll.u32 %s257_s0, 4  ;;  %s1308_s15 = sadd.s32 1, %s993_s23  ;;  %s264_s9 = int_to_ptr.vmem [resolvable:$true] %s263_s9 }
  0x36   : > { %s1176_s18 = scalar_select %p148_p11, %s993_s23, %s1308_s15  }
  0x37   : > { %s254_s19 = scalar_lea.sflag [#allocation4], %s253_s17  ;;  %p891_p4 = pneg %p1134_p2 }
  0x38   : > { %s902_s1 = scalar_lea.vmem %s264_s9, 256  ;;  %s1011_s20 = smov [#allocation8]  }
  0x39   : > { %p903_p13 = scmp.ne.s32.totalorder %s264_s9, %s902_s1  ;;  %s907_s26 = sshll.u32 %s1011_s20, 4  ;;  %s908_s26 = int_to_ptr.vmem [resolvable:$false] %s907_s26 }
  0x3a   : > { %s909_s30 = scalar_lea.vmem %s908_s26, 512  ;;  %p910_p3 = scmp.lt.s32.totalorder %s264_s9, %s908_s26 }
  0x3b   : > { %p905_p5 = pnand %p903_p13, %p891_p4  ;;  %p911_p9 = scmp.lt.s32.totalorder %s909_s30, %s902_s1 }
  0x3d   : > { %p906_p1 = pneg %p905_p5  ;;  %p912_p8 = por %p911_p9, %p910_p3 }
  0x3f   : > { %p913_p0 = pnand %p912_p8, %p906_p1 }
  0x41   : > { %916 = shalt.err (!%p913_p0)
}
  0x42   : > { %s1012_s0 = smov 128   ;;  %s1309_s29 = smov 4  }
  0x43   : > { %s1310_s17 = smov 64   ;;  %275 = sbr.rel (%p1118_p12) target bundleno = 858 (0x35a), region = 44 }
  0x44   : > { %752 = dma.hbm_to_vmem [thread:$0]  (!%p1134_p2), %s262_s14, 256, %s264_s9, %s254_s19, %s1012_s0, %s1310_s17, %s1309_s29  }
  0x45   : > { %p1311_p10 = scmp.eq.s32.totalorder (!%p1118_p12), %s1087_s27, 0 }
  0x48   : > { %968 = dma.done.wait (%p1311_p10), [#allocation4], 128   ;;  %p1312_p6 = pmov %p1311_p10 }
  0x4a   : > { %970 = vsyncadd (%p1312_p6), [#allocation4], 4294967168  ;;  %p1313_p11 = pmov %p1312_p6 }
  0x4b   : > { %p1314_p4 = pmov %p1312_p6 }
  0x4c   : > { %972 = dma.done.wait (%p1313_p11), [#allocation7], 256  }
  0x4d   : > { %974 = vsyncadd (%p1314_p4), [#allocation7], 4294967040  ;;  %s285_s1 = sand.u32 1, %s1087_s27   ;;  %s1196_s26 = sand.u32 1, %s989_s22  }
  0x4e   : > { %s680_s9 = sshll.u32 %s1196_s26, 4  ;;  %s286_s10 = scalar_lea.sflag [#allocation4], %s285_s1 }
  0x4f   : > { %s1199_s16 = scalar_lea.vmem [#allocation8], %s680_s9 }
  0x50   : > { %976 = dma.done.wait (%p1104_p7), %s286_s10, 256  }
  0x51   : > { %978 = vsyncadd (%p1104_p7), %s286_s10, 4294967040  ;;  %s681_s19 = sshll.u32 %s1196_s26, 3  ;;  %p682_p12 = scmp.ne.s32.totalorder %s997_s24, 0 }
  0x52   : > { %s1206_s13 = scalar_lea.vmem [#allocation9], %s681_s19 }
  0x53   : > { %324 = sbr.rel (%p682_p12) target bundleno = 635 (0x27b), region = 60 }
  0x58   : > { %v823_v0 = vld [vmem:[#allocation6 + $0x8] sm:$0xff]   ;;  %v1013_v1 = vmov 0.0   ;;  %v824_v2 = vld [vmem:[#allocation6] sm:$0xff]   ;;  %vm1014_vm0 = vmmov 0   ;;  %v825_v3 = vld [vmem:[#allocation3] sm:$0xff]   ;;  %vm354_vm1 = vcmask 261120   ;;  %v333_v4 = vlaneseq }
  0x59   : > { %714 = vmatprep.subr.bf16.mxu0 %v1013_v1  ;;  %718 = vmatprep.mubr.msk.bf16.mxu0 %vm1014_vm0, %v1013_v1  ;;  %v331_v6 = vld [vmem:[%s1283_s2] sm:$0x1]  ;;  %vm468_vm2 = vcmask 257024  }
  0x5a   : > { %715 = vmatpush3.bf16.msra.mxu0 %v823_v0  ;;  %v334_v5 = vshrl.u32 %v333_v4, 7  ;;  %v332_v7 = vunpack.c.l.bf16 %v331_v6  ;;  %v444_v52 = vld [vmem:[%s1284_s3] sm:$0x1] }
  0x5b   : > { %716 = vmatprep.subr.bf16.mxu0 %v1013_v1  ;;  %v452_v53 = vld [vmem:[%s1285_s4] sm:$0x1]  ;;  %v445_v54 = vunpack.c.l.bf16 %v444_v52 }
  0x5c   : > { %v335_v8 = vsub.s32 0, %v334_v5  ;;  %v453_v55 = vunpack.c.l.bf16 %v452_v53 }
  0x5e   : > { %717 = vmatpush3.bf16.msra.mxu0 %v824_v2  ;;  %v336_v9 = vrot.slane %v332_v7, %v335_v8  ;;  %v449_v56 = vrot.slane %v445_v54, %v335_v8  ;;  %v457_v58 = vrot.slane %v453_v55, %v335_v8 }
  0x61   : > { %719 = vmatmul.mubr.msk.bf16.vlgmr.msra.gmra.mxu0 %vm354_vm1, %v825_v3 }
 0x121   : > { %v392_v10 = vpop.f32.mrf.mxu0 }
 0x122   : > { %v393_v11 = vadd.f32 %v392_v10, %v336_v9 }
 0x123   : > { %v720_v12 = vpop.f32.mrf.mxu0 }
 0x124   : > { %v401_v13 = vmul.f32 0.044715, %v393_v11  ;;  %v399_v27 = vmul.f32 0.5, %v393_v11 }
 0x125   : > { %v395_v14 = vpop.f32.mrf.mxu0 }
 0x126   : > { %v396_v15 = vadd.f32 %v395_v14, %v336_v9  ;;  %v403_v16 = vmul.f32 %v401_v13, %v393_v11 }
 0x127   : > { %v721_v17 = vpop.f32.mrf.mxu0 }
 0x128   : > { %v402_v18 = vmul.f32 0.044715, %v396_v15  ;;  %v405_v19 = vmul.f32 %v403_v16, %v393_v11  ;;  %v400_v32 = vmul.f32 0.5, %v396_v15 }
 0x12a   : > { %v407_v20 = vadd.f32 %v405_v19, %v393_v11  ;;  %v404_v21 = vmul.f32 %v402_v18, %v396_v15 }
 0x12c   : > { %v409_v22 = vmul.f32 0.7978846, %v407_v20  ;;  %v406_v23 = vmul.f32 %v404_v21, %v396_v15 }
 0x12e   : > { %826 = vtanh.f32 %v409_v22  ;;  %v408_v24 = vadd.f32 %v406_v23, %v396_v15 }
 0x130   : > { %v410_v25 = vmul.f32 0.7978846, %v408_v24 }
 0x132   : > { %828 = vtanh.f32 %v410_v25 }
 0x13b   : > { %v827_v26 = vpop.eup %826 }
 0x13c   : > { %v413_v28 = vadd.f32 1.0, %v827_v26 }
 0x13e   : > { %v415_v29 = vmul.f32 %v413_v28, %v399_v27 }
 0x13f   : > { %v829_v30 = vpop.eup %828 }
 0x140   : > { %v417_v31 = vsel %vm354_vm1, %v415_v29, 0.0  ;;  %v414_v33 = vadd.f32 1.0, %v829_v30 }
 0x141   : > { %418 = vadd.xlane.f32.xlu0 %v417_v31 }
 0x142   : > { %v416_v34 = vmul.f32 %v414_v33, %v400_v32 }
 0x144   : > { %v420_v35 = vsel %vm354_vm1, %v416_v34, 0.0 }
 0x145   : > { %421 = vadd.xlane.f32.xlu0 %v420_v35 }
 0x1ca   : > { %v419_v36 = vpop.xlane.xlu0 %418 }
 0x1cb   : > { %v424_v37 = vmul.f32 0.03125, %v419_v36 }
 0x1cd   : > { %v426_v38 = vsub.f32 %v415_v29, %v424_v37 }
 0x1ce   : > { %v422_v39 = vpop.xlane.xlu0 %421 }
 0x1cf   : > { %v425_v40 = vmul.f32 0.03125, %v422_v39  ;;  %v428_v41 = vmul.f32 %v426_v38, %v426_v38 }
 0x1d1   : > { %v427_v42 = vsub.f32 %v416_v34, %v425_v40  ;;  %v430_v43 = vsel %vm354_vm1, %v428_v41, 0.0 }
 0x1d2   : > { %431 = vadd.xlane.f32.xlu1 %v430_v43 }
 0x1d3   : > { %v429_v44 = vmul.f32 %v427_v42, %v427_v42 }
 0x1d5   : > { %v433_v45 = vsel %vm354_vm1, %v429_v44, 0.0 }
 0x1d6   : > { %434 = vadd.xlane.f32.xlu1 %v433_v45 }
 0x25b   : > { %v432_v46 = vpop.xlane.xlu1 %431 }
 0x25c   : > { %v436_v47 = vmul.f32 0.03125, %v432_v46 }
 0x25e   : > { %v438_v48 = vadd.f32 1e-05, %v436_v47 }
 0x25f   : > { %v435_v49 = vpop.xlane.xlu1 %434 }
 0x260   : > { %830 = vrsqrt.f32 %v438_v48  ;;  %v437_v50 = vmul.f32 0.03125, %v435_v49 }
 0x262   : > { %v439_v51 = vadd.f32 1e-05, %v437_v50 }
 0x264   : > { %832 = vrsqrt.f32 %v439_v51 }
 0x26d   : > { %v831_v57 = vpop.eup %830 }
 0x26e   : > { %v442_v59 = vmul.f32 %v831_v57, %v426_v38 }
 0x270   : > { %v450_v60 = vmul.f32 %v449_v56, %v442_v59 }
 0x271   : > { %v833_v61 = vpop.eup %832 }
 0x272   : > { %v458_v62 = vadd.f32 %v457_v58, %v450_v60  ;;  %v443_v63 = vmul.f32 %v833_v61, %v427_v42 }
 0x274   : > { %v699_v0 = vpack.c.bf16 %v458_v62, %v458_v62  ;;  %v451_v1 = vmul.f32 %v449_v56, %v443_v63 }
 0x276   : > { %469 = vst.msk [vmem:[#allocation2] sm:$0xf] %vm468_vm2, %v699_v0  ;;  %v459_v2 = vadd.f32 %v457_v58, %v451_v1 }
 0x278   : > { %v700_v3 = vpack.c.bf16 %v459_v2, %v459_v2 }
 0x27a   : > { %470 = vst.msk [vmem:[#allocation2 + $0x4] sm:$0xf] %vm468_vm2, %v700_v3 }
 0x27b PF: > { %v834_v4 = vld [vmem:[%s1199_s16 + $0x8] sm:$0xff]   ;;  %v1015_v5 = vmov 0.0   ;;  %v835_v6 = vld [vmem:[%s1199_s16] sm:$0xff]   ;;  %vm1016_vm3 = vmmov 0   ;;  %vm494_vm4 = vcmask 261120   ;;  %s696_s20 = sshll.u32 %s997_s24, 6 }
 0x27c   : > { %722 = vmatprep.subr.bf16.mxu0 %v1015_v5  ;;  %726 = vmatprep.mubr.msk.bf16.mxu0 %vm1016_vm3, %v1015_v5  ;;  %s565_s30 = sshll.u32 %s1206_s13, 4  ;;  %s1230_s17 = scalar_lea.hbm %s1287_s6, %s696_s20  ;;  %s1232_s30 = int_to_ptr.vmem [resolvable:$true] %s565_s30 }
 0x27d   : > { %723 = vmatpush3.bf16.msra.mxu0 %v834_v4  ;;  %s550_s1 = scalar_lea.sflag [#allocation5], %s1196_s26  ;;  %s917_s9 = scalar_lea.vmem %s1232_s30, 128 }
 0x27e   : > { %724 = vmatprep.subr.bf16.mxu0 %v1015_v5  ;;  %p918_p7 = scmp.ne.s32.totalorder %s1232_s30, %s917_s9  ;;  %p1315_p2 = scmp.ne.s32.totalorder %s1300_s8, 0 }
 0x27f   : > { %s1017_s24 = smov [#allocation9]  }
 0x280   : > { %p919_p13 = pnand %p918_p7, %p1315_p2  ;;  %s921_s10 = sshll.u32 %s1017_s24, 4  ;;  %s922_s10 = int_to_ptr.vmem [resolvable:$false] %s921_s10 }
 0x281   : > { %v836_v7 = vld [vmem:[#allocation2] sm:$0xff]   ;;  %725 = vmatpush3.bf16.msra.mxu0 %v835_v6  ;;  %s923_s16 = scalar_lea.vmem %s922_s10, 256  ;;  %p924_p1 = scmp.lt.s32.totalorder %s1232_s30, %s922_s10 }
 0x282   : > { %p920_p5 = pneg %p919_p13  ;;  %p925_p3 = scmp.lt.s32.totalorder %s923_s16, %s917_s9 }
 0x284   : > { %727 = vmatmul.mubr.msk.bf16.vlgmr.msra.gmra.mxu0 %vm494_vm4, %v836_v7  ;;  %p926_p9 = por %p925_p3, %p924_p1 }
 0x286   : > { %p927_p8 = pnand %p926_p9, %p920_p5 }
 0x344   : > { %v532_v8 = vpop.f32.mrf.mxu0 }
 0x346   : > { %v728_v9 = vpop.f32.mrf.mxu0 }
 0x348   : > { %v535_v10 = vpop.f32.mrf.mxu0 }
 0x349   : > { %v706_v11 = vpack.c.bf16 %v535_v10, %v532_v8 }
 0x34a   : > { %v729_v12 = vpop.f32.mrf.mxu0 }
 0x34b   : > { %707 = vst [vmem:[%s1206_s13] sm:$0xff] %v706_v11  }
 0x34c   : > { %930 = shalt.err (!%p927_p8)
}
 0x34d   : > { %s931_s19 = scalar_lea.hbm %s1230_s17, 128  ;;  %s935_s7 = scalar_lea.hbm %s1287_s6, 256 }
 0x34e   : > { %p932_p0 = scmp.ne.s32.totalorder %s1230_s17, %s931_s19  ;;  %p936_p11 = scmp.lt.s32.totalorder %s1230_s17, %s1287_s6 }
 0x34f   : > { %p937_p4 = scmp.lt.s32.totalorder %s935_s7, %s931_s19 }
 0x350   : > { %p933_p10 = pnand %p932_p0, %p1315_p2 }
 0x351   : > { %p938_p12 = por %p937_p4, %p936_p11 }
 0x352   : > { %p934_p6 = pneg %p933_p10 }
 0x354   : > { %p939_p7 = pnand %p938_p12, %p934_p6 }
 0x356   : > { %942 = shalt.err (!%p939_p7)
}
 0x357   : > { %s1018_s14 = smov 64   ;;  %s1019_s15 = smov 128  }
 0x358   : > { %s1020_s20 = smov 4  }
 0x359   : > { %740 = dma.vmem_to_hbm [thread:$0]  (%p1315_p2), %s1232_s30, 128, %s1230_s17, %s550_s1, %s1018_s14, %s1019_s15, %s1020_s20  }
 0x35a PF: > { %s1316_s0 = sld [smem:[#allocation15_spill]]  ;;  %s580_s9 = sand.u32 1, %s985_s21  }
 0x35b   : > { %s1317_s29 = sld [smem:[#allocation14_spill]]  ;;  %s581_s24 = scalar_lea.sflag [#allocation5], %s580_s9 }
 0x360   : > { %p1318_p13 = scmp.ne.s32.totalorder %s1316_s0, 0 }
 0x361   : > { %p1319_p5 = scmp.ge.s32.totalorder %s1317_s29, 2 }
 0x363   : > { %p754_p1 = pnand %p1319_p5, %p1318_p13 }
 0x365   : > { %p755_p3 = pneg %p754_p1 }
 0x367   : > { %980 = dma.done.wait (%p755_p3), %s581_s24, 128  }
 0x368   : > { %982 = vsyncadd (%p755_p3), %s581_s24, 4294967168  ;;  %s21_s26 = sadd.s32 1, %s1317_s29   ;;  %s1320_s21 = smov %s989_s22 }
 0x369   : > { %p18_p9 = scmp.ge.s32.totalorder %s21_s26, 4   ;;  %s1321_s22 = smov %s993_s23 }
 0x36a   : > { %s1322_s23 = smov %s1176_s18  ;;  %s1323_s24 = smov %s1001_s25 }
 0x36b   : > { %s1324_s25 = smov %s1326_s12  ;;  %20 = sbr.rel (!%p18_p9) target bundleno = 9 (0x9), region = 101 }
 0x370   :  { %586 = vsyncpa [#allocation4], 1 }
 0x371   :  { %588 = vsyncpa [#allocation4 + $0x1], 1 }
 0x372   :  { %589 = vsyncpa [#allocation7], 1 }
 0x373   :  { %590 = vsyncpa [#allocation5], 1 }
 0x374   :  { %592 = vsyncpa [#allocation5 + $0x1], 1 }

</bundles_post_ra>
